<compile_context>
chip_gen: v5e
topology: v5e:2x2
jax: 0.10.0
libtpu: 0.0.40
codegen_flags: <defaults>
</compile_context>

<pallas_src>
import functools

import jax
import jax.numpy as jnp
from jax import lax
from jax.experimental import pallas as pl
from jax.experimental.pallas import tpu as pltpu

INPUT_DIM = 32
NET_ARCH = (64, 64)
OUTPUT_DIM = 4
DROPOUT_P = 0.5
TILE_B_MAX = 4096  # sized well under v7x's 64 MiB VMEM / 32 MiB scoped default


def _s32(v):
    """Python int -> equivalent signed 32-bit value (for jnp.int32 constants)."""
    v &= 0xFFFFFFFF
    return v - (1 << 32) if v >= (1 << 31) else v


_C_ROW = _s32(0x9E3779B1)
_C_COL = _s32(0x85EBCA6B)
_C_SEED = _s32(0x27D4EB2F)
_M1 = _s32(0x7FEB352D)
_M2 = _s32(0x846CA68B)


def _round_up(n, m):
    return ((n + m - 1) // m) * m


def _softplus(x):
    # Matches torch.nn.Softplus(beta=1, threshold=20); log1p for numerics.
    return jnp.where(x > 20.0, x, jnp.log1p(jnp.exp(jnp.minimum(x, 20.0))))


def _keep_mask(shape, row0, seed, salt, dropout_p):
    """Boolean keep-mask via a counter-based hash (no TPU PRNG primitives)."""
    rows = lax.broadcasted_iota(jnp.int32, shape, 0) + row0
    cols = lax.broadcasted_iota(jnp.int32, shape, 1)
    v = rows * _C_ROW + cols * _C_COL + seed * _C_SEED
    v = v + jnp.int32(_s32(salt * 0x94D049BB))
    # lowbias32 finalizer.
    v = v ^ lax.shift_right_logical(v, 16)
    v = v * _M1
    v = v ^ lax.shift_right_logical(v, 15)
    v = v * _M2
    v = v ^ lax.shift_right_logical(v, 16)
    threshold = int(round(dropout_p * float(1 << 24)))
    return (v & 0xFFFFFF) >= threshold  # keep with probability 1 - p


def mlp_kernel(seed_ref,                                # scalar-prefetch (SMEM)
               x_ref, w1_ref, b1_ref, w2_ref, b2_ref, w3_ref, b3_ref,
               out_ref,
               *, output_dim, dropout_p, training, tile_b):
    """Whole MLP fused per batch tile (everything fits comfortably in VMEM)."""
    seed = seed_ref[0]
    row0 = pl.program_id(0) * tile_b
    keep_scale = 1.0 / (1.0 - dropout_p)

    def dense_relu_dropout(h_in, w_ref, b_ref, salt):
        # bf16 MXU matmul, f32 accumulation, f32 bias.
        h = jnp.dot(h_in, w_ref[...], preferred_element_type=jnp.float32)
        h = h + b_ref[...]
        # relu(dropout(h)) == where(keep, relu(h) * scale, 0): one select.
        h = jnp.maximum(h, 0.0)
        if training:
            keep = _keep_mask(h.shape, row0, seed, salt, dropout_p)
            h = jnp.where(keep, h * keep_scale, 0.0)
        return h

    h = dense_relu_dropout(x_ref[...], w1_ref, b1_ref, salt=1)
    h = dense_relu_dropout(h.astype(w2_ref.dtype), w2_ref, b2_ref, salt=2)

    # Final layer: 2*output_dim units (mean head | aleatoric variance head),
    # written as one lane-dense slab; softplus applied only on the var lanes.
    out = jnp.dot(h.astype(w3_ref.dtype), w3_ref[...],
                  preferred_element_type=jnp.float32) + b3_ref[...]
    col = lax.broadcasted_iota(jnp.int32, out.shape, 1)
    out_ref[...] = jnp.where(col >= output_dim, _softplus(out) + 1e-6, out)


def network_forward(x, params, *, seed=0, training=True):
    """params = [(w1, b1), (w2, b2), (w3, b3)] with w_i of shape (in, out)."""
    (w1, b1), (w2, b2), (w3, b3) = params
    batch = x.shape[0]
    out_width = b3.shape[0]                 # 2 * output_dim
    output_dim = out_width // 2

    # --- batch tiling (pad to a multiple of the tile so every block is full) ---
    tile_b = min(TILE_B_MAX, _round_up(batch, 8))
    padded = _round_up(batch, tile_b)
    xp = x if padded == batch else jnp.pad(x, ((0, padded - batch), (0, 0)))
    grid = (padded // tile_b,)

    # bf16 matmul operands; biases stay f32 and broadcast as (1, features).
    xb = xp.astype(jnp.bfloat16)
    w1b, w2b, w3b = (w.astype(jnp.bfloat16) for w in (w1, w2, w3))
    b1r, b2r, b3r = (b.reshape(1, -1).astype(jnp.float32) for b in (b1, b2, b3))

    seed_arr = jnp.asarray([seed], dtype=jnp.int32)

    def const_spec(arr):
        # Weights/biases: one full-array block, resident across all batch tiles.
        return pl.BlockSpec(arr.shape, lambda i, s: (0,) * arr.ndim)

    in_specs = [
        pl.BlockSpec((tile_b, xb.shape[1]), lambda i, s: (i, 0)),   # x tile
        const_spec(w1b), const_spec(b1r),
        const_spec(w2b), const_spec(b2r),
        const_spec(w3b), const_spec(b3r),
    ]
    out_spec = pl.BlockSpec((tile_b, out_width), lambda i, s: (i, 0))

    kernel = functools.partial(
        mlp_kernel,
        output_dim=output_dim,
        dropout_p=DROPOUT_P,
        training=training,
        tile_b=tile_b,
    )

    f = pl.pallas_call(
        kernel,
        out_shape=jax.ShapeDtypeStruct((padded, out_width), jnp.float32),
        grid_spec=pltpu.PrefetchScalarGridSpec(
            num_scalar_prefetch=1,
            grid=grid,
            in_specs=in_specs,
            out_specs=out_spec,
        ),
        compiler_params=pltpu.CompilerParams(
            dimension_semantics=("parallel",)),
    )
    out = f(seed_arr, xb, w1b, b1r, w2b, b2r, w3b, b3r)
    out = out[:batch]
    mean = out[:, :output_dim]
    variance = out[:, output_dim:]
    return mean, variance


def reference_forward_eval(x, params):
    """Pure-JAX eval-mode (no dropout) reference, f32."""
    (w1, b1), (w2, b2), (w3, b3) = params
    h = jnp.maximum(x @ w1 + b1, 0.0)
    h = jnp.maximum(h @ w2 + b2, 0.0)
    out = h @ w3 + b3
    mean = out[:, :OUTPUT_DIM]
    variance = jax.nn.softplus(out[:, OUTPUT_DIM:]) + 1e-6
    return mean, variance


def init_params(key):
    """Deterministic init mimicking nn.Linear default U(-1/sqrt(fan_in), +)."""
    dims = [INPUT_DIM, *NET_ARCH, 2 * OUTPUT_DIM]
    params = []
    for fan_in, fan_out in zip(dims[:-1], dims[1:]):
        key, kw, kb = jax.random.split(key, 3)
        bound = 1.0 / (fan_in ** 0.5)
        w = jax.random.uniform(kw, (fan_in, fan_out), jnp.float32, -bound, bound)
        b = jax.random.uniform(kb, (fan_out,), jnp.float32, -bound, bound)
        params.append((w, b))
    return params


if __name__ == "__main__":
    key = jax.random.PRNGKey(0)
    key, kx = jax.random.split(key)

    batch = 8
    x = jax.random.normal(kx, (batch, INPUT_DIM), jnp.float32)
    params = init_params(key)

    # Training-mode pass (dropout active).
    mean_t, var_t = network_forward(x, params, seed=1234, training=True)
    jax.block_until_ready((mean_t, var_t))
    assert mean_t.shape == (batch, OUTPUT_DIM)
    assert var_t.shape == (batch, OUTPUT_DIM)
    assert bool(jnp.all(jnp.isfinite(mean_t)))
    assert bool(jnp.all(var_t > 0.0))       # Softplus(.) + 1e-6 strictly positive

    # Eval-mode pass (deterministic) against a pure-JAX reference.
    mean_e, var_e = network_forward(x, params, seed=0, training=False)
    ref_mean, ref_var = reference_forward_eval(x, params)
    assert bool(jnp.allclose(mean_e, ref_mean, atol=0.1, rtol=0.1))
    assert bool(jnp.allclose(var_e, ref_var, atol=0.1, rtol=0.1))

    print("KERNEL_OK")
</pallas_src>

<mosaic_0001>
module attributes {stable_mosaic.version = 11 : i64} {
  func.func @mlp_kernel(%arg0: i32, %arg1: memref<1xi32, #tpu.memory_space<smem>>, %arg2: memref<8x32xbf16, #tpu.memory_space<vmem>>, %arg3: memref<32x64xbf16, #tpu.memory_space<vmem>>, %arg4: memref<1x64xf32, #tpu.memory_space<vmem>>, %arg5: memref<64x64xbf16, #tpu.memory_space<vmem>>, %arg6: memref<1x64xf32, #tpu.memory_space<vmem>>, %arg7: memref<64x8xbf16, #tpu.memory_space<vmem>>, %arg8: memref<1x8xf32, #tpu.memory_space<vmem>>, %arg9: memref<8x8xf32, #tpu.memory_space<vmem>>) attributes {dimension_semantics = [#tpu.dimension_semantics<parallel>], iteration_bounds = array<i64: 1>, scalar_prefetch = 1 : i64, scratch_operands = 0 : i64, tpu.core_type = #tpu.core_type<tc>, window_params = [{transform_indices = @transform_0, window_bounds = array<i64: 8, 32>}, {pipeline_mode = #tpu.pipeline_mode<synchronous>, transform_indices = @transform_1, window_bounds = array<i64: 32, 64>}, {pipeline_mode = #tpu.pipeline_mode<synchronous>, transform_indices = @transform_2, window_bounds = array<i64: 1, 64>}, {pipeline_mode = #tpu.pipeline_mode<synchronous>, transform_indices = @transform_3, window_bounds = array<i64: 64, 64>}, {pipeline_mode = #tpu.pipeline_mode<synchronous>, transform_indices = @transform_4, window_bounds = array<i64: 1, 64>}, {pipeline_mode = #tpu.pipeline_mode<synchronous>, transform_indices = @transform_5, window_bounds = array<i64: 64, 8>}, {pipeline_mode = #tpu.pipeline_mode<synchronous>, transform_indices = @transform_6, window_bounds = array<i64: 1, 8>}, {transform_indices = @transform_7, window_bounds = array<i64: 8, 8>}]} {
    %c0 = arith.constant 0 : index
    %0 = memref.load %arg1[%c0] : memref<1xi32, #tpu.memory_space<smem>>
    %c8_i32 = arith.constant 8 : i32
    %1 = arith.muli %arg0, %c8_i32 : i32
    %c0_0 = arith.constant 0 : index
    %c0_1 = arith.constant 0 : index
    %2 = vector.load %arg2[%c0_0, %c0_1] : memref<8x32xbf16, #tpu.memory_space<vmem>>, vector<8x32xbf16>
    %c0_2 = arith.constant 0 : index
    %c0_3 = arith.constant 0 : index
    %3 = vector.load %arg3[%c0_2, %c0_3] : memref<32x64xbf16, #tpu.memory_space<vmem>>, vector<32x64xbf16>
    %cst = arith.constant dense<0.000000e+00> : vector<8x64xf32>
    %4 = tpu.matmul %2, %3, %cst {dimension_numbers = #tpu.dot_dimension_numbers<[1], [0], [0], [1], [0, 0, 1, 1], [], []>} : vector<8x32xbf16>, vector<32x64xbf16>, vector<8x64xf32> -> vector<8x64xf32>
    %c0_4 = arith.constant 0 : index
    %c0_5 = arith.constant 0 : index
    %5 = vector.load %arg4[%c0_4, %c0_5] : memref<1x64xf32, #tpu.memory_space<vmem>>, vector<1x64xf32>
    %6 = vector.broadcast %5 : vector<1x64xf32> to vector<8x64xf32>
    %7 = arith.addf %4, %6 : vector<8x64xf32>
    %cst_6 = arith.constant 0.000000e+00 : f32
    %8 = vector.broadcast %cst_6 : f32 to vector<8x64xf32>
    %9 = arith.maximumf %7, %8 : vector<8x64xf32>
    %10 = tpu.iota {dimensions = array<i32: 0>} : vector<8x64xi32>
    %11 = vector.broadcast %1 : i32 to vector<8x64xi32>
    %12 = arith.addi %10, %11 : vector<8x64xi32>
    %13 = tpu.iota {dimensions = array<i32: 1>} : vector<8x64xi32>
    %c-1640531535_i32 = arith.constant -1640531535 : i32
    %14 = vector.broadcast %c-1640531535_i32 : i32 to vector<8x64xi32>
    %15 = arith.muli %12, %14 : vector<8x64xi32>
    %c-2048144789_i32 = arith.constant -2048144789 : i32
    %16 = vector.broadcast %c-2048144789_i32 : i32 to vector<8x64xi32>
    %17 = arith.muli %13, %16 : vector<8x64xi32>
    %18 = arith.addi %15, %17 : vector<8x64xi32>
    %c668265263_i32 = arith.constant 668265263 : i32
    %19 = arith.muli %0, %c668265263_i32 : i32
    %20 = vector.broadcast %19 : i32 to vector<8x64xi32>
    %21 = arith.addi %18, %20 : vector<8x64xi32>
    %c-1798288965_i32 = arith.constant -1798288965 : i32
    %22 = vector.broadcast %c-1798288965_i32 : i32 to vector<8x64xi32>
    %23 = arith.addi %21, %22 : vector<8x64xi32>
    %c16_i32 = arith.constant 16 : i32
    %24 = vector.broadcast %c16_i32 : i32 to vector<8x64xi32>
    %25 = arith.shrui %23, %24 : vector<8x64xi32>
    %26 = arith.xori %23, %25 : vector<8x64xi32>
    %c2146121005_i32 = arith.constant 2146121005 : i32
    %27 = vector.broadcast %c2146121005_i32 : i32 to vector<8x64xi32>
    %28 = arith.muli %26, %27 : vector<8x64xi32>
    %c15_i32 = arith.constant 15 : i32
    %29 = vector.broadcast %c15_i32 : i32 to vector<8x64xi32>
    %30 = arith.shrui %28, %29 : vector<8x64xi32>
    %31 = arith.xori %28, %30 : vector<8x64xi32>
    %c-2073254261_i32 = arith.constant -2073254261 : i32
    %32 = vector.broadcast %c-2073254261_i32 : i32 to vector<8x64xi32>
    %33 = arith.muli %31, %32 : vector<8x64xi32>
    %c16_i32_7 = arith.constant 16 : i32
    %34 = vector.broadcast %c16_i32_7 : i32 to vector<8x64xi32>
    %35 = arith.shrui %33, %34 : vector<8x64xi32>
    %36 = arith.xori %33, %35 : vector<8x64xi32>
    %c16777215_i32 = arith.constant 16777215 : i32
    %37 = vector.broadcast %c16777215_i32 : i32 to vector<8x64xi32>
    %38 = arith.andi %36, %37 : vector<8x64xi32>
    %c8388608_i32 = arith.constant 8388608 : i32
    %39 = vector.broadcast %c8388608_i32 : i32 to vector<8x64xi32>
    %40 = arith.cmpi sge, %38, %39 : vector<8x64xi32>
    %cst_8 = arith.constant 2.000000e+00 : f32
    %41 = vector.broadcast %cst_8 : f32 to vector<8x64xf32>
    %42 = arith.mulf %9, %41 : vector<8x64xf32>
    %cst_9 = arith.constant 0.000000e+00 : f32
    %43 = vector.broadcast %cst_9 : f32 to vector<8x64xf32>
    %44 = arith.select %40, %42, %43 : vector<8x64xi1>, vector<8x64xf32>
    %45 = arith.truncf %44 : vector<8x64xf32> to vector<8x64xbf16>
    %c0_10 = arith.constant 0 : index
    %c0_11 = arith.constant 0 : index
    %46 = vector.load %arg5[%c0_10, %c0_11] : memref<64x64xbf16, #tpu.memory_space<vmem>>, vector<64x64xbf16>
    %cst_12 = arith.constant dense<0.000000e+00> : vector<8x64xf32>
    %47 = tpu.matmul %45, %46, %cst_12 {dimension_numbers = #tpu.dot_dimension_numbers<[1], [0], [0], [1], [0, 0, 1, 1], [], []>} : vector<8x64xbf16>, vector<64x64xbf16>, vector<8x64xf32> -> vector<8x64xf32>
    %c0_13 = arith.constant 0 : index
    %c0_14 = arith.constant 0 : index
    %48 = vector.load %arg6[%c0_13, %c0_14] : memref<1x64xf32, #tpu.memory_space<vmem>>, vector<1x64xf32>
    %49 = vector.broadcast %48 : vector<1x64xf32> to vector<8x64xf32>
    %50 = arith.addf %47, %49 : vector<8x64xf32>
    %cst_15 = arith.constant 0.000000e+00 : f32
    %51 = vector.broadcast %cst_15 : f32 to vector<8x64xf32>
    %52 = arith.maximumf %50, %51 : vector<8x64xf32>
    %53 = tpu.iota {dimensions = array<i32: 0>} : vector<8x64xi32>
    %54 = vector.broadcast %1 : i32 to vector<8x64xi32>
    %55 = arith.addi %53, %54 : vector<8x64xi32>
    %56 = tpu.iota {dimensions = array<i32: 1>} : vector<8x64xi32>
    %c-1640531535_i32_16 = arith.constant -1640531535 : i32
    %57 = vector.broadcast %c-1640531535_i32_16 : i32 to vector<8x64xi32>
    %58 = arith.muli %55, %57 : vector<8x64xi32>
    %c-2048144789_i32_17 = arith.constant -2048144789 : i32
    %59 = vector.broadcast %c-2048144789_i32_17 : i32 to vector<8x64xi32>
    %60 = arith.muli %56, %59 : vector<8x64xi32>
    %61 = arith.addi %58, %60 : vector<8x64xi32>
    %c668265263_i32_18 = arith.constant 668265263 : i32
    %62 = arith.muli %0, %c668265263_i32_18 : i32
    %63 = vector.broadcast %62 : i32 to vector<8x64xi32>
    %64 = arith.addi %61, %63 : vector<8x64xi32>
    %c698389366_i32 = arith.constant 698389366 : i32
    %65 = vector.broadcast %c698389366_i32 : i32 to vector<8x64xi32>
    %66 = arith.addi %64, %65 : vector<8x64xi32>
    %c16_i32_19 = arith.constant 16 : i32
    %67 = vector.broadcast %c16_i32_19 : i32 to vector<8x64xi32>
    %68 = arith.shrui %66, %67 : vector<8x64xi32>
    %69 = arith.xori %66, %68 : vector<8x64xi32>
    %c2146121005_i32_20 = arith.constant 2146121005 : i32
    %70 = vector.broadcast %c2146121005_i32_20 : i32 to vector<8x64xi32>
    %71 = arith.muli %69, %70 : vector<8x64xi32>
    %c15_i32_21 = arith.constant 15 : i32
    %72 = vector.broadcast %c15_i32_21 : i32 to vector<8x64xi32>
    %73 = arith.shrui %71, %72 : vector<8x64xi32>
    %74 = arith.xori %71, %73 : vector<8x64xi32>
    %c-2073254261_i32_22 = arith.constant -2073254261 : i32
    %75 = vector.broadcast %c-2073254261_i32_22 : i32 to vector<8x64xi32>
    %76 = arith.muli %74, %75 : vector<8x64xi32>
    %c16_i32_23 = arith.constant 16 : i32
    %77 = vector.broadcast %c16_i32_23 : i32 to vector<8x64xi32>
    %78 = arith.shrui %76, %77 : vector<8x64xi32>
    %79 = arith.xori %76, %78 : vector<8x64xi32>
    %c16777215_i32_24 = arith.constant 16777215 : i32
    %80 = vector.broadcast %c16777215_i32_24 : i32 to vector<8x64xi32>
    %81 = arith.andi %79, %80 : vector<8x64xi32>
    %c8388608_i32_25 = arith.constant 8388608 : i32
    %82 = vector.broadcast %c8388608_i32_25 : i32 to vector<8x64xi32>
    %83 = arith.cmpi sge, %81, %82 : vector<8x64xi32>
    %cst_26 = arith.constant 2.000000e+00 : f32
    %84 = vector.broadcast %cst_26 : f32 to vector<8x64xf32>
    %85 = arith.mulf %52, %84 : vector<8x64xf32>
    %cst_27 = arith.constant 0.000000e+00 : f32
    %86 = vector.broadcast %cst_27 : f32 to vector<8x64xf32>
    %87 = arith.select %83, %85, %86 : vector<8x64xi1>, vector<8x64xf32>
    %88 = arith.truncf %87 : vector<8x64xf32> to vector<8x64xbf16>
    %c0_28 = arith.constant 0 : index
    %c0_29 = arith.constant 0 : index
    %89 = vector.load %arg7[%c0_28, %c0_29] : memref<64x8xbf16, #tpu.memory_space<vmem>>, vector<64x8xbf16>
    %cst_30 = arith.constant dense<0.000000e+00> : vector<8x8xf32>
    %90 = tpu.matmul %88, %89, %cst_30 {dimension_numbers = #tpu.dot_dimension_numbers<[1], [0], [0], [1], [0, 0, 1, 1], [], []>} : vector<8x64xbf16>, vector<64x8xbf16>, vector<8x8xf32> -> vector<8x8xf32>
    %c0_31 = arith.constant 0 : index
    %c0_32 = arith.constant 0 : index
    %91 = vector.load %arg8[%c0_31, %c0_32] : memref<1x8xf32, #tpu.memory_space<vmem>>, vector<1x8xf32>
    %92 = vector.broadcast %91 : vector<1x8xf32> to vector<8x8xf32>
    %93 = arith.addf %90, %92 : vector<8x8xf32>
    %94 = tpu.iota {dimensions = array<i32: 1>} : vector<8x8xi32>
    %c4_i32 = arith.constant 4 : i32
    %95 = vector.broadcast %c4_i32 : i32 to vector<8x8xi32>
    %96 = arith.cmpi sge, %94, %95 : vector<8x8xi32>
    %cst_33 = arith.constant 2.000000e+01 : f32
    %97 = vector.broadcast %cst_33 : f32 to vector<8x8xf32>
    %98 = arith.cmpf ogt, %93, %97 : vector<8x8xf32>
    %cst_34 = arith.constant 2.000000e+01 : f32
    %99 = vector.broadcast %cst_34 : f32 to vector<8x8xf32>
    %100 = arith.minimumf %93, %99 : vector<8x8xf32>
    %101 = math.exp %100 : vector<8x8xf32>
    %102 = math.log1p %101 : vector<8x8xf32>
    %103 = arith.select %98, %93, %102 : vector<8x8xi1>, vector<8x8xf32>
    %cst_35 = arith.constant 9.99999997E-7 : f32
    %104 = vector.broadcast %cst_35 : f32 to vector<8x8xf32>
    %105 = arith.addf %103, %104 : vector<8x8xf32>
    %106 = arith.select %96, %105, %93 : vector<8x8xi1>, vector<8x8xf32>
    %c0_36 = arith.constant 0 : index
    %c0_37 = arith.constant 0 : index
    %107 = vector.load %arg9[%c0_36, %c0_37] : memref<8x8xf32, #tpu.memory_space<vmem>>, vector<8x8xf32>
    tpu.vector_store %arg9[%c0_36, %c0_37], %106 {strides = array<i32>} : memref<8x8xf32, #tpu.memory_space<vmem>>, vector<8x8xf32>,
    return
  }
  func.func @transform_0(%arg0: i32, %arg1: memref<1xi32, #tpu.memory_space<smem>>) -> (i32, i32) {
    %c0_i32 = arith.constant 0 : i32
    %c0_i32_0 = arith.constant 0 : i32
    return %arg0, %c0_i32 : i32, i32
  }
  func.func @transform_1(%arg0: i32, %arg1: memref<1xi32, #tpu.memory_space<smem>>) -> (i32, i32) {
    %c0_i32 = arith.constant 0 : i32
    %c0_i32_0 = arith.constant 0 : i32
    %c0_i32_1 = arith.constant 0 : i32
    return %c0_i32, %c0_i32_0 : i32, i32
  }
  func.func @transform_2(%arg0: i32, %arg1: memref<1xi32, #tpu.memory_space<smem>>) -> (i32, i32) {
    %c0_i32 = arith.constant 0 : i32
    %c0_i32_0 = arith.constant 0 : i32
    %c0_i32_1 = arith.constant 0 : i32
    return %c0_i32, %c0_i32_0 : i32, i32
  }
  func.func @transform_3(%arg0: i32, %arg1: memref<1xi32, #tpu.memory_space<smem>>) -> (i32, i32) {
    %c0_i32 = arith.constant 0 : i32
    %c0_i32_0 = arith.constant 0 : i32
    %c0_i32_1 = arith.constant 0 : i32
    return %c0_i32, %c0_i32_0 : i32, i32
  }
  func.func @transform_4(%arg0: i32, %arg1: memref<1xi32, #tpu.memory_space<smem>>) -> (i32, i32) {
    %c0_i32 = arith.constant 0 : i32
    %c0_i32_0 = arith.constant 0 : i32
    %c0_i32_1 = arith.constant 0 : i32
    return %c0_i32, %c0_i32_0 : i32, i32
  }
  func.func @transform_5(%arg0: i32, %arg1: memref<1xi32, #tpu.memory_space<smem>>) -> (i32, i32) {
    %c0_i32 = arith.constant 0 : i32
    %c0_i32_0 = arith.constant 0 : i32
    %c0_i32_1 = arith.constant 0 : i32
    return %c0_i32, %c0_i32_0 : i32, i32
  }
  func.func @transform_6(%arg0: i32, %arg1: memref<1xi32, #tpu.memory_space<smem>>) -> (i32, i32) {
    %c0_i32 = arith.constant 0 : i32
    %c0_i32_0 = arith.constant 0 : i32
    %c0_i32_1 = arith.constant 0 : i32
    return %c0_i32, %c0_i32_0 : i32, i32
  }
  func.func @transform_7(%arg0: i32, %arg1: memref<1xi32, #tpu.memory_space<smem>>) -> (i32, i32) {
    %c0_i32 = arith.constant 0 : i32
    %c0_i32_0 = arith.constant 0 : i32
    return %arg0, %c0_i32 : i32, i32
  }
}

</mosaic_0001>

<bundles_post_ra>
// kernel: tpu_custom_call.1
= control target key start
LH: loop header
LB: loop body
LE: loop exit
PB: predicated region body
PF: predicated region fallthrough
CT: control target
= control target key end

     0   :  { %14 = vsyncpa [#allocation5], 0  ;;  %s485_s0 = inlined_call_operand.<no memory space> [shape: s32[1], index: 0, kind: input, shape index: {}]   ;;  %s486_s1 = inlined_call_operand.vmem [shape: bf16[8,32], index: 1, kind: input, shape index: {}]   ;;  %s487_s2 = inlined_call_operand.hbm [shape: bf16[32,64], index: 2, kind: input, shape index: {}]   ;;  %s488_s3 = inlined_call_operand.vmem [shape: f32[1,64], index: 3, kind: input, shape index: {}]   ;;  %s489_s4 = inlined_call_operand.vmem [shape: bf16[64,64], index: 4, kind: input, shape index: {}]   ;;  %s490_s5 = inlined_call_operand.vmem [shape: f32[1,64], index: 5, kind: input, shape index: {}]   ;;  %s491_s6 = inlined_call_operand.vmem [shape: bf16[64,8], index: 6, kind: input, shape index: {}]   ;;  %s492_s7 = inlined_call_operand.vmem [shape: f32[1,8], index: 7, kind: input, shape index: {}]   ;;  %s493_s8 = inlined_call_operand.hbm [shape: f32[8,8], index: 8, kind: output, shape index: {}]  }
   0x1   :  { %15 = vsyncpa [#allocation6], 0  ;;  %s22_s29 = sshll.u32 %s487_s2, 4  ;;  %s385_s30 = smov [#allocation4]   ;;  %s23_s29 = int_to_ptr.hbm [resolvable:$true] %s22_s29 }
   0x2   :  { %s24_s9 = sshll.u32 %s385_s30, 4  ;;  %s386_s10 = smov 64   ;;  %s25_s9 = int_to_ptr.vmem [resolvable:$true] %s24_s9 }
   0x3   :  { %s387_s11 = smov 4  }
   0x4   :  { %30 = dma.hbm_to_vmem [thread:$0]  %s23_s29, 256, %s25_s9, [#allocation5], %s386_s10, %s386_s10, %s387_s11  }
   0x5   :  { %381 = dma.done.wait [#allocation5], 256  }
   0x6   :  { %382 = vsyncadd [#allocation5], 4294967040  ;;  %v313_v0 = vld [vmem:[#allocation4 + $0x8] sm:$0xff]  ;;  %v317_v1 = vld [vmem:[%s489_s4 + $0x18] sm:$0xff]  ;;  %vm69_vm0 = vcmask 261120   ;;  %v87_v5 = vlaneseq  ;;  %vm149_vm2 = vcmask 523264  }
   0x7   :  { %79 = vmatpush.bf16.msra.mxu0 %v313_v0  ;;  %v312_v2 = vld [vmem:[#allocation4] sm:$0xff]  ;;  %157 = vmatpush.bf16.msra.mxu1 %v317_v1  ;;  %v316_v3 = vld [vmem:[%s489_s4 + $0x10] sm:$0xff]  ;;  %s96_s19 = smul.u32 668265263, %s485_s0  ;;  %v315_v15 = vld [vmem:[%s489_s4 + $0x8] sm:$0xff]  ;;  %s259_s13 = sshll.u32 %s493_s8, 4  ;;  %s260_s13 = int_to_ptr.hbm [resolvable:$true] %s259_s13 }
   0x8   :  { %v48_v4 = vld [vmem:[%s486_s1] sm:$0xf]  ;;  %v88_v6 = vshrl.u32 %v87_v5, 7  ;;  %v446_v7 = vand.u32 127, %v87_v5  ;;  %v321_v19 = vld [vmem:[%s491_s6 + $0x18] sm:$0xff]  ;;  %v320_v21 = vld [vmem:[%s491_s6 + $0x10] sm:$0xff] }
   0x9   :  { %v97_v11 = vstv %s96_s19  ;;  %v314_v17 = vld [vmem:[%s489_s4] sm:$0xff]  ;;  %224 = vmatpush.bf16.msra.mxu2 %v321_v19  ;;  %v319_v37 = vld [vmem:[%s491_s6 + $0x8] sm:$0xff]  ;;  %vm250_vm7 = vcmask 64512  }
   0xa   :  { %v93_v8 = vmul.u32 2654435761, %v88_v6  ;;  %v94_v9 = vmul.u32 2246822507, %v446_v7  ;;  %v326_v26 = vld [vmem:[%s488_s3] ss:$0 sm:$0xff] }
   0xb   :  { %80 = vmatpush.bf16.msra.mxu0 %v312_v2  ;;  %158 = vmatpush.bf16.msra.mxu1 %v316_v3  ;;  %v318_v39 = vld [vmem:[%s491_s6] sm:$0xff]  ;;  %vm233_vm6 = vcmp.ge.s32.totalorder %v446_v7, 4 }
   0xc   :  { %v95_v10 = vadd.s32 %v94_v9, %v93_v8  ;;  %v327_v46 = vld [vmem:[%s490_s5] ss:$0 sm:$0xff]  ;;  %s388_s5 = smov [#allocation7]  }
   0xd   :  { %225 = vmatpush.bf16.msra.mxu2 %v320_v21  ;;  %v328_v55 = vld [vmem:[%s492_s7] ss:$0 sm:$0xff]  ;;  %s257_s7 = sshll.u32 %s388_s5, 4  ;;  %s258_s7 = int_to_ptr.vmem [resolvable:$true] %s257_s7 }
   0xe   :  { %277 = vmatmul.msk.bf16.vlgmr.msra.gmra.mxu0 %vm69_vm0, %v48_v4  ;;  %v98_v12 = vadd.s32 %v97_v11, %v95_v10 }
   0xf   :  { %159 = vmatpush.bf16.msra.mxu1 %v315_v15 }
  0x10   :  { %v99_v13 = vadd.s32 2496678331, %v98_v12  ;;  %v167_v35 = vadd.s32 698389366, %v98_v12 }
  0x11   :  { %226 = vmatpush.bf16.msra.mxu2 %v319_v37 }
  0x12   :  { %v100_v14 = vshrl.u32 %v99_v13, 16  ;;  %v168_v36 = vshrl.u32 %v167_v35, 16 }
  0x13   :  { %160 = vmatpush.bf16.msra.mxu1 %v314_v17 }
  0x14   :  { %v101_v16 = vxor.u32 %v100_v14, %v99_v13  ;;  %v169_v38 = vxor.u32 %v168_v36, %v167_v35 }
  0x15   :  { %227 = vmatpush.bf16.msra.mxu2 %v318_v39 }
  0x16   :  { %v102_v18 = vmul.u32 2146121005, %v101_v16  ;;  %v170_v40 = vmul.u32 2146121005, %v169_v38 }
  0x18   :  { %v103_v20 = vshrl.u32 %v102_v18, 15  ;;  %v171_v41 = vshrl.u32 %v170_v40, 15 }
  0x1a   :  { %v104_v22 = vxor.u32 %v103_v20, %v102_v18  ;;  %v172_v42 = vxor.u32 %v171_v41, %v170_v40 }
  0x1c   :  { %v105_v23 = vmul.u32 2221713035, %v104_v22  ;;  %v173_v43 = vmul.u32 2221713035, %v172_v42 }
  0x1e   :  { %v106_v24 = vshrl.u32 %v105_v23, 16  ;;  %v174_v44 = vshrl.u32 %v173_v43, 16 }
  0x20   :  { %v107_v25 = vxor.u32 %v106_v24, %v105_v23  ;;  %v175_v45 = vxor.u32 %v174_v44, %v173_v43 }
  0x22   :  { %v108_v28 = vand.u32 16777215, %v107_v25  ;;  %v176_v48 = vand.u32 16777215, %v175_v45 }
  0x24   :  { %vm109_vm1 = vcmp.ge.s32.totalorder %v108_v28, 8388608  ;;  %vm177_vm3 = vcmp.ge.s32.totalorder %v176_v48, 8388608 }
  0x8b   :  { %v82_v27 = vpop.f32.mrf.mxu0 }
  0x8c   :  { %v83_v29 = vadd.f32 %v326_v26, %v82_v27 }
  0x8e   :  { %v86_v30 = vmax.f32 %v83_v29, 0.0 }
  0x90   :  { %v110_v31 = vmul.f32 2.0, %v86_v30 }
  0x92   :  { %v111_v32 = vsel %vm109_vm1, %v110_v31, 0.0 }
  0x93   :  { %v112_v33 = vpack.c.bf16 %v111_v32, %v111_v32  ;;  %v84_v34 = vpop.f32.mrf.mxu0 }
  0x95   :  { %294 = vmatmul.msk.bf16.vlgmr.msra.gmra.mxu1 %vm149_vm2, %v112_v33 }
 0x112   :  { %v162_v47 = vpop.f32.mrf.mxu1 }
 0x113   :  { %v163_v49 = vadd.f32 %v327_v46, %v162_v47 }
 0x115   :  { %v166_v50 = vmax.f32 %v163_v49, 0.0 }
 0x117   :  { %v178_v51 = vmul.f32 2.0, %v166_v50 }
 0x119   :  { %v179_v52 = vsel %vm177_vm3, %v178_v51, 0.0 }
 0x11a   :  { %v180_v53 = vpack.c.bf16 %v179_v52, %v179_v52  ;;  %v164_v54 = vpop.f32.mrf.mxu1 }
 0x11c   :  { %311 = vmatmul.msk.bf16.vlgmr.msra.gmra.mxu2 %vm149_vm2, %v180_v53 }
 0x19f   :  { %v229_v56 = vpop.f32.mrf.mxu2 }
 0x1a0   :  { %v230_v57 = vadd.f32 %v328_v55, %v229_v56 }
 0x1a2   :  { %v235_v58 = vmin.f32 %v230_v57, 20.0  ;;  %vm234_vm5 = vcmp.gt.f32.partialorder %v230_v57, 20.0 }
 0x1a4   :  { %v236_v59 = vmul.f32 1.442695, %v235_v58 }
 0x1a6   :  { %329 = vpow2.f32 %v236_v59 }
 0x1a7   :  { %v231_v60 = vpop.f32.mrf.mxu2 }
 0x1ac   :  { %v330_v61 = vpop.eup %329 }
 0x1ad   :  { %v238_v62 = vadd.f32 1.0, %v330_v61  ;;  %v241_v63 = vmul.f32 -0.5, %v330_v61  ;;  %v244_v1 = vand.u32 2147483647, %v330_v61 }
 0x1af   :  { %331 = vlog2.f32 %v238_v62  ;;  %v242_v0 = vadd.f32 1.0, %v241_v63  ;;  %vm245_vm4 = vcmp.lt.f32.partialorder %v244_v1, 0.0004427343 }
 0x1b1   :  { %v243_v4 = vmul.f32 %v330_v61, %v242_v0 }
 0x1b5   :  { %v332_v2 = vpop.eup %331 }
 0x1b6   :  { %v240_v3 = vmul.f32 0.6931472, %v332_v2 }
 0x1b8   :  { %v246_v5 = vsel %vm245_vm4, %v243_v4, %v240_v3 }
 0x1b9   :  { %v247_v6 = vsel %vm234_vm5, %v230_v57, %v246_v5 }
 0x1ba   :  { %v248_v8 = vadd.f32 1e-06, %v247_v6 }
 0x1bc   :  { %v249_v9 = vsel %vm233_vm6, %v248_v8, %v230_v57 }
 0x1bd   :  { %251 = vst.msk [vmem:[#allocation7] sm:$0xff] %vm250_vm7, %v249_v9 }
 0x1be   :  { %262 = dma.vmem_to_hbm [thread:$0]  %s258_s7, 128, %s260_s13, [#allocation6]  }
 0x1bf   :  { %383 = dma.done.wait [#allocation6], 128  }
 0x1c0   :  { %384 = vsyncadd [#allocation6], 4294967168 }
 0x1c1   :  { %267 = vsyncpa [#allocation5], 1 }
 0x1c2   :  { %268 = vsyncpa [#allocation6], 1 }

</bundles_post_ra>
